<compile_context>
chip_gen: v5e
topology: v5e:2x2
jax: 0.10.0
libtpu: 0.0.40
codegen_flags: <defaults>
</compile_context>

<pallas_src>
import functools

import jax
import jax.numpy as jnp
from jax import lax
from jax.experimental import pallas as pl
from jax.experimental.pallas import tpu as pltpu

block_size = 4
n_embd = 256
head_size = 32
LANES = 128


def head_kernel(x_ref, w_ref, o_ref, *, Hp, scale):
    """One batch element per grid step.

    x_ref: (T, C) f32      -- this batch element's tokens
    w_ref: (C, 3*Hp) bf16  -- fused, lane-padded [Wk | Wq | Wv] (VMEM-resident)
    o_ref: (T, Hp) f32     -- lane-dense output tile (first H columns = head out)
    """
    x = x_ref[...].astype(jnp.bfloat16)     # in-kernel cast: no extra XLA HBM pass
    w = w_ref[...]

    # Fused QKV projection: bf16 operands, f32 accumulation on the MXU.
    qkv = jnp.dot(x, w, preferred_element_type=jnp.float32)         # (T, 3*Hp) f32

    # 128-lane-aligned column slices; re-cast to bf16 for the next MXU ops.
    k = qkv[:, 0 * Hp:1 * Hp].astype(jnp.bfloat16)                   # (T, Hp)
    q = qkv[:, 1 * Hp:2 * Hp].astype(jnp.bfloat16)
    v = qkv[:, 2 * Hp:3 * Hp].astype(jnp.bfloat16)

    # Scores: q @ k^T, contracting on the (padded) head dim; zero padding
    # columns contribute nothing to the dot products.
    s = lax.dot_general(q, k, (((1,), (1,)), ((), ())),
                        preferred_element_type=jnp.float32) * scale  # (T, T) f32

    # Causal mask from 2-D iota (per-batch grid step -> no block-diagonal term).
    T = x_ref.shape[0]
    ri = lax.broadcasted_iota(jnp.int32, (T, T), 0)
    ci = lax.broadcasted_iota(jnp.int32, (T, T), 1)
    s = jnp.where(ci <= ri, s, -1e30)

    # Numerically-stable softmax in f32; denominator via approx EUP reciprocal.
    s = s - jnp.max(s, axis=-1, keepdims=True)
    p = jnp.exp(s)
    p = p * pl.reciprocal(jnp.sum(p, axis=-1, keepdims=True), approx=True)

    # TODO(synk): dropout on the attention weights omitted (eval mode).
    o_ref[...] = jnp.dot(p.astype(jnp.bfloat16), v,
                         preferred_element_type=jnp.float32).astype(o_ref.dtype)


def prepare_fused_qkv_weight(wk, wq, wv, lanes=LANES):
    """Param-prep (call once, not per forward): zero-pad each (C, H) weight to
    (C, Hp) with Hp a multiple of 128 lanes, concatenate to [K | Q | V], cast
    to bf16."""
    C, H = wk.shape
    Hp = ((H + lanes - 1) // lanes) * lanes
    pad = lambda w: jnp.pad(w, ((0, 0), (0, Hp - H)))
    wqkv = jnp.concatenate([pad(wk), pad(wq), pad(wv)], axis=1).astype(jnp.bfloat16)
    return wqkv, Hp


def head_forward(x, wqkv, head_size):
    """x: (B, T, C) f32; wqkv: (C, 3*Hp) bf16 from prepare_fused_qkv_weight."""
    B, T, C = x.shape
    Hp = wqkv.shape[1] // 3
    # NOTE: bigram.py scales by C**-0.5 (n_embd), not head_size**-0.5.
    scale = C ** (-0.5)

    out_padded = pl.pallas_call(
        functools.partial(head_kernel, Hp=Hp, scale=scale),
        out_shape=jax.ShapeDtypeStruct((B, T, Hp), jnp.float32),
        grid=(B,),
        in_specs=[
            pl.BlockSpec((None, T, C), lambda b: (b, 0, 0)),   # per-batch x tile
            pl.BlockSpec((C, 3 * Hp), lambda b: (0, 0)),       # weight resident in VMEM
        ],
        out_specs=pl.BlockSpec((None, T, Hp), lambda b: (b, 0, 0)),
        compiler_params=pltpu.CompilerParams(
            dimension_semantics=("parallel",)),                # v7x: batches across TCs
    )(x, wqkv)
    return out_padded[:, :, :head_size]                        # drop zero padding lanes


def head_reference(x, wk, wq, wv):
    # Same math as the PyTorch module, on the same bf16-rounded inputs the
    # kernel consumes (accumulation / softmax in f32).
    B, T, C = x.shape
    xb = x.astype(jnp.bfloat16).astype(jnp.float32)
    wkb = wk.astype(jnp.bfloat16).astype(jnp.float32)
    wqb = wq.astype(jnp.bfloat16).astype(jnp.float32)
    wvb = wv.astype(jnp.bfloat16).astype(jnp.float32)
    k = xb @ wkb
    q = xb @ wqb
    v = xb @ wvb
    wei = jnp.einsum("bth,bsh->bts", q, k) * (C ** -0.5)
    tril = jnp.tril(jnp.ones((T, T), dtype=jnp.float32))
    wei = jnp.where(tril == 0, -jnp.inf, wei)
    wei = jax.nn.softmax(wei, axis=-1)
    return jnp.einsum("bts,bsh->bth", wei, v)


if __name__ == "__main__":
    key = jax.random.PRNGKey(0)
    kx, kk, kq, kv = jax.random.split(key, 4)

    B, T, C, H = 2, block_size, n_embd, head_size
    x = jax.random.normal(kx, (B, T, C), dtype=jnp.float32)

    # Deterministic init matching nn.Linear(n_embd, head_size, bias=False),
    # stored transposed as (C, H) so the kernel computes x @ W.
    bound = 1.0 / (C ** 0.5)
    wk = jax.random.uniform(kk, (C, H), jnp.float32, -bound, bound)
    wq = jax.random.uniform(kq, (C, H), jnp.float32, -bound, bound)
    wv = jax.random.uniform(kv, (C, H), jnp.float32, -bound, bound)

    # Fused/padded bf16 weight built once at param-prep time (hoisted out of
    # the per-forward path, per perf feedback).
    wqkv, _ = prepare_fused_qkv_weight(wk, wq, wv)
    wqkv = jax.block_until_ready(wqkv)

    out = head_forward(x, wqkv, H)
    out = jax.block_until_ready(out)

    ref = head_reference(x, wk, wq, wv)
    assert out.shape == (B, T, H)
    assert jnp.allclose(out, ref, atol=1e-2, rtol=1e-2), "mismatch vs JAX reference"

    print("KERNEL_OK")
</pallas_src>

<mosaic_0001>
module attributes {stable_mosaic.version = 11 : i64} {
  func.func @head_kernel(%arg0: i32, %arg1: memref<1x4x256xf32, #tpu.memory_space<vmem>>, %arg2: memref<256x384xbf16, #tpu.memory_space<vmem>>, %arg3: memref<1x4x128xf32, #tpu.memory_space<vmem>>) attributes {dimension_semantics = [#tpu.dimension_semantics<parallel>], iteration_bounds = array<i64: 2>, scalar_prefetch = 0 : i64, scratch_operands = 0 : i64, tpu.core_type = #tpu.core_type<tc>, window_params = [{transform_indices = @transform_0, window_bounds = array<i64: 1, 4, 256>}, {pipeline_mode = #tpu.pipeline_mode<synchronous>, transform_indices = @transform_1, window_bounds = array<i64: 256, 384>}, {transform_indices = @transform_2, window_bounds = array<i64: 1, 4, 128>}]} {
    %c0 = arith.constant 0 : index
    %c0_0 = arith.constant 0 : index
    %c0_1 = arith.constant 0 : index
    %0 = vector.load %arg1[%c0, %c0_0, %c0_1] : memref<1x4x256xf32, #tpu.memory_space<vmem>>, vector<1x4x256xf32>
    %1 = vector.shape_cast %0 : vector<1x4x256xf32> to vector<4x256xf32>
    %2 = arith.truncf %1 : vector<4x256xf32> to vector<4x256xbf16>
    %c0_2 = arith.constant 0 : index
    %c0_3 = arith.constant 0 : index
    %3 = vector.load %arg2[%c0_2, %c0_3] : memref<256x384xbf16, #tpu.memory_space<vmem>>, vector<256x384xbf16>
    %cst = arith.constant dense<0.000000e+00> : vector<4x384xf32>
    %4 = tpu.matmul %2, %3, %cst {dimension_numbers = #tpu.dot_dimension_numbers<[1], [0], [0], [1], [0, 0, 1, 1], [], []>} : vector<4x256xbf16>, vector<256x384xbf16>, vector<4x384xf32> -> vector<4x384xf32>
    %5 = vector.extract_strided_slice %4 {offsets = [0, 0], sizes = [4, 128], strides = [1, 1]} : vector<4x384xf32> to vector<4x128xf32>
    %6 = arith.truncf %5 : vector<4x128xf32> to vector<4x128xbf16>
    %7 = vector.extract_strided_slice %4 {offsets = [0, 128], sizes = [4, 128], strides = [1, 1]} : vector<4x384xf32> to vector<4x128xf32>
    %8 = arith.truncf %7 : vector<4x128xf32> to vector<4x128xbf16>
    %9 = vector.extract_strided_slice %4 {offsets = [0, 256], sizes = [4, 128], strides = [1, 1]} : vector<4x384xf32> to vector<4x128xf32>
    %10 = arith.truncf %9 : vector<4x128xf32> to vector<4x128xbf16>
    %cst_4 = arith.constant dense<0.000000e+00> : vector<4x4xf32>
    %11 = tpu.matmul %8, %6, %cst_4 {dimension_numbers = #tpu.dot_dimension_numbers<[1], [1], [0], [0], [0, 0, 1, 0], [], []>} : vector<4x128xbf16>, vector<4x128xbf16>, vector<4x4xf32> -> vector<4x4xf32>
    %cst_5 = arith.constant 6.250000e-02 : f32
    %12 = vector.broadcast %cst_5 : f32 to vector<4x4xf32>
    %13 = arith.mulf %11, %12 : vector<4x4xf32>
    %14 = tpu.iota {dimensions = array<i32: 0>} : vector<4x4xi32>
    %15 = tpu.iota {dimensions = array<i32: 1>} : vector<4x4xi32>
    %16 = arith.cmpi sle, %15, %14 : vector<4x4xi32>
    %cst_6 = arith.constant -1.000000e+30 : f32
    %17 = vector.broadcast %cst_6 : f32 to vector<4x4xf32>
    %18 = arith.select %16, %13, %17 : vector<4x4xi1>, vector<4x4xf32>
    %cst_7 = arith.constant dense<0xFF800000> : vector<4xf32>
    %19 = vector.multi_reduction <maximumf>, %18, %cst_7 [1] : vector<4x4xf32> to vector<4xf32>
    %20 = vector.shape_cast %19 : vector<4xf32> to vector<4x1xf32>
    %21 = vector.broadcast %20 : vector<4x1xf32> to vector<4x4xf32>
    %22 = arith.subf %18, %21 : vector<4x4xf32>
    %23 = math.exp %22 : vector<4x4xf32>
    %cst_8 = arith.constant dense<0.000000e+00> : vector<4xf32>
    %24 = vector.multi_reduction <add>, %23, %cst_8 [1] : vector<4x4xf32> to vector<4xf32>
    %25 = vector.shape_cast %24 : vector<4xf32> to vector<4x1xf32>
    %26 = tpu.reciprocal %25 {approx = true} : vector<4x1xf32> -> vector<4x1xf32>
    %27 = vector.broadcast %26 : vector<4x1xf32> to vector<4x4xf32>
    %28 = arith.mulf %23, %27 : vector<4x4xf32>
    %29 = arith.truncf %28 : vector<4x4xf32> to vector<4x4xbf16>
    %cst_9 = arith.constant dense<0.000000e+00> : vector<4x128xf32>
    %30 = tpu.matmul %29, %10, %cst_9 {dimension_numbers = #tpu.dot_dimension_numbers<[1], [0], [0], [1], [0, 0, 1, 1], [], []>} : vector<4x4xbf16>, vector<4x128xbf16>, vector<4x128xf32> -> vector<4x128xf32>
    %c0_10 = arith.constant 0 : index
    %c0_11 = arith.constant 0 : index
    %c0_12 = arith.constant 0 : index
    %31 = vector.load %arg3[%c0_10, %c0_11, %c0_12] : memref<1x4x128xf32, #tpu.memory_space<vmem>>, vector<1x4x128xf32>
    %32 = vector.shape_cast %31 : vector<1x4x128xf32> to vector<4x128xf32>
    %33 = vector.shape_cast %30 : vector<4x128xf32> to vector<1x4x128xf32>
    tpu.vector_store %arg3[%c0_10, %c0_11, %c0_12], %33 {strides = array<i32>} : memref<1x4x128xf32, #tpu.memory_space<vmem>>, vector<1x4x128xf32>,
    return
  }
  func.func @transform_0(%arg0: i32) -> (i32, i32, i32) {
    %c0_i32 = arith.constant 0 : i32
    %c0_i32_0 = arith.constant 0 : i32
    %c0_i32_1 = arith.constant 0 : i32
    return %arg0, %c0_i32, %c0_i32_0 : i32, i32, i32
  }
  func.func @transform_1(%arg0: i32) -> (i32, i32) {
    %c0_i32 = arith.constant 0 : i32
    %c0_i32_0 = arith.constant 0 : i32
    %c0_i32_1 = arith.constant 0 : i32
    return %c0_i32, %c0_i32_0 : i32, i32
  }
  func.func @transform_2(%arg0: i32) -> (i32, i32, i32) {
    %c0_i32 = arith.constant 0 : i32
    %c0_i32_0 = arith.constant 0 : i32
    %c0_i32_1 = arith.constant 0 : i32
    return %arg0, %c0_i32, %c0_i32_0 : i32, i32, i32
  }
}

</mosaic_0001>

<bundles_post_ra>
// kernel: tpu_custom_call.1
= control target key start
LH: loop header
LB: loop body
LE: loop exit
PB: predicated region body
PF: predicated region fallthrough
CT: control target
= control target key end

     0   :  { %7 = vsyncpa [#allocation3], 0  ;;  %s1363_s0 = inlined_call_operand.hbm [shape: f32[2,4,256], index: 0, kind: input, shape index: {}]   ;;  %s1364_s1 = inlined_call_operand.hbm [shape: bf16[256,384], index: 1, kind: input, shape index: {}]   ;;  %s1365_s2 = inlined_call_operand.hbm [shape: f32[2,4,128], index: 2, kind: output, shape index: {}]  }
   0x1   :  { %9 = vsyncpa [#allocation3 + $0x1], 0 }
   0x2   :  { %10 = vsyncpa [#allocation6], 0 }
   0x3   :  { %11 = vsyncpa [#allocation4], 0 }
   0x4   :  { %13 = vsyncpa [#allocation4 + $0x1], 0  ;;  %s1211_s9 = smov 0   ;;  %s1213_s10 = smov 0  }
   0x5   :  { %s1215_s11 = smov 0   ;;  %s1217_s12 = smov 0  }
   0x6 LB: > { %s108_s15 = sshll.u32 %s1364_s1, 4  ;;  %s1235_s16 = sadd.s32 4294967295, %s1191_s12   ;;  %s1191_s12 = sphi %s1217_s12, %s1375_s12   ;;  %s1187_s11 = sphi %s1215_s11, %s1374_s11   ;;  %s1183_s10 = sphi %s1213_s10, %s1373_s10   ;;  %s1179_s9 = sphi %s1211_s9, %s1372_s9   ;;  %s109_s15 = int_to_ptr.hbm [resolvable:$true] %s108_s15 }
   0x7   : > { %p742_p0 = scmp.ge.s32.totalorder %s1191_s12, 1  ;;  %p40_p1 = scmp.eq.s32.totalorder %s1235_s16, 0 }
   0x8   : > { %p97_p2 = scmp.lt.s32.totalorder %s1191_s12, 3  ;;  %s1193_s18 = smov [#allocation5]  }
   0x9   : > { %s110_s19 = sshll.u32 %s1193_s18, 4  ;;  %s1194_s20 = smov 192   ;;  %s111_s19 = int_to_ptr.vmem [resolvable:$true] %s110_s19 }
   0xa   : > { %p1240_p3 = pnand %p742_p0, %p97_p2  ;;  %s1195_s21 = smov 12  }
   0xb   : > { %s741_s22 = sadd.s32 4294967294, %s1191_s12   ;;  %s1251_s23 = sadd.s32 1, %s1191_s12  }
   0xc   : > { %p1006_p4 = pneg %p1240_p3  ;;  %s26_s24 = sadd.s32 1, %s1187_s11 }
   0xd   : > { %s23_s25 = ssub.s32 %s1191_s12, %s1251_s23  ;;  %p33_p7 = scmp.ne.s32.totalorder %s1187_s11, %s1183_s10 }
   0xe   : > { %p1007_p6 = pnand %p1006_p4, %p40_p1  ;;  %p24_p8 = scmp.eq.s32.totalorder %s23_s25, 0 }
   0xf   : > { %p34_p9 = scmp.eq.s32.totalorder %s1191_s12, 0  ;;  %p39_p10 = scmp.ne.s32.totalorder %s1183_s10, %s1179_s9 }
  0x10   : > { %1009 = dma.hbm_to_vmem [thread:$0]  (!%p1007_p6), %s109_s15, 6144, %s111_s19, [#allocation6], %s1194_s20, %s1194_s20, %s1195_s21  }
  0x11   : > { %p84_p11 = scmp.eq.s32.totalorder %s1235_s16, 1  ;;  %p1267_p12 = por %p40_p1, %p39_p10 }
  0x12   : > { %s1263_s26 = scalar_select %p24_p8, %s1187_s11, %s26_s24  }
  0x13   : > { %p1271_p13 = por %p84_p11, %p33_p7  ;;  %p90_p0 = scmp.eq.s32.totalorder %s741_s22, 1 }
  0x14   : > { %p35_p2 = por %p34_p9, %p33_p7  ;;  %s124_s29 = sand.u32 1, %s1187_s11  }
  0x15   : > { %p1276_p4 = por %p90_p0, %p39_p10  ;;  %p1019_p6 = scmp.lt.s32.totalorder %s1191_s12, 2 }
  0x16   : > { %s745_s3 = sshll.u32 %s124_s29, 3  ;;  %s949_s4 = sshll.u32 %s1191_s12, 3 }
  0x17   : > { %s133_s7 = scalar_lea.hbm %s1363_s0, %s949_s4  ;;  %s128_s13 = scalar_lea.vmem [#allocation2], %s745_s3 }
  0x18   : > { %s135_s8 = sshll.u32 %s133_s7, 4  ;;  %s137_s14 = sshll.u32 %s128_s13, 4  ;;  %s136_s8 = int_to_ptr.hbm [resolvable:$true] %s135_s8  ;;  %s138_s14 = int_to_ptr.vmem [resolvable:$true] %s137_s14 }
  0x19   : > { %p1285_p8 = pnand %p1019_p6, %p35_p2  ;;  %s125_s18 = scalar_lea.sflag [#allocation3], %s124_s29 }
  0x1a   : > { %s1091_s19 = sshra.s32 %s136_s8, 4  ;;  %s1098_s24 = scalar_lea.hbm %s1363_s0, 16  ;;  %s1092_s19 = int_to_ptr.hbm [resolvable:$true] %s1091_s19 }
  0x1b   : > { %s1093_s20 = scalar_lea.hbm %s1092_s19, 8  ;;  %p1095_p9 = pneg %p1285_p8 }
  0x1c   : > { %p1094_p7 = scmp.ne.s32.totalorder %s1092_s19, %s1093_s20  ;;  %p1099_p0 = scmp.lt.s32.totalorder %s1092_s19, %s1363_s0 }
  0x1d   : > { %p1100_p2 = scmp.lt.s32.totalorder %s1098_s24, %s1093_s20 }
  0x1e   : > { %p1096_p10 = pnand %p1095_p9, %p1094_p7 }
  0x1f   : > { %p1101_p6 = por %p1100_p2, %p1099_p0 }
  0x20   : > { %p1097_p11 = pneg %p1096_p10 }
  0x22   : > { %p1102_p5 = pnand %p1101_p6, %p1097_p11 }
  0x24   : > { %1105 = shalt.err (!%p1102_p5)
}
  0x25   : > { %1013 = dma.hbm_to_vmem [thread:$0]  (!%p1285_p8), %s136_s8, 128, %s138_s14, %s125_s18  }
  0x26   : > { %146 = sbr.rel (%p1240_p3) target bundleno = 750 (0x2ee), region = 28  ;;  %s1302_s29 = sand.u32 (!%p1240_p3), 1, %s1183_s10  }
  0x27   : > { %s749_s4 = sshll.u32 (!%p1240_p3), %s1302_s29, 3  ;;  %s149_s5 = scalar_lea.sflag (!%p1240_p3), [#allocation3], %s1302_s29 }
  0x28   : > { %s1306_s6 = scalar_lea.vmem (!%p1240_p3), [#allocation2], %s749_s4 }
  0x2b   : > { %1166 = dma.done.wait (%p1267_p12), %s149_s5, 128  }
  0x2c   : > { %1168 = vsyncadd (%p1267_p12), %s149_s5, 4294967168 }
  0x2d   : > { %1170 = dma.done.wait (%p40_p1), [#allocation6], 6144  }
  0x2e   : > { %1172 = vsyncadd (%p40_p1), [#allocation6], 4294961152  ;;  %v838_v0 = vld [vmem:[#allocation5 + $0xa8] sm:$0xf]  ;;  %v972_v1 = vld [vmem:[#allocation5 + $0xb0] sm:$0xf0] }
  0x2f   : > { %v934_v2 = vld [vmem:[#allocation5 + $0x168] sm:$0xf]  ;;  %v839_v3 = vor.u32 %v972_v1, %v838_v0  ;;  %v996_v4 = vld [vmem:[#allocation5 + $0x170] sm:$0xf0]  ;;  %v971_v5 = vld [vmem:[#allocation5 + $0xac] sm:$0xf] }
  0x30   : > { %v840_v6 = vld [vmem:[#allocation5 + $0xb4] sm:$0xf0]  ;;  %v935_v7 = vor.u32 %v996_v4, %v934_v2  ;;  %v995_v9 = vld [vmem:[#allocation5 + $0x16c] sm:$0xf]  ;;  %v826_v11 = vld [vmem:[#allocation5 + $0x90] sm:$0xf] }
  0x31   : > { %v843_v8 = vor.u32 %v971_v5, %v840_v6  ;;  %v936_v10 = vld [vmem:[#allocation5 + $0x174] sm:$0xf0]  ;;  %509 = vmatpush.bf16.msra.mxu0 %v839_v3  ;;  %v969_v13 = vld [vmem:[#allocation5 + $0x98] sm:$0xf0]  ;;  %v922_v14 = vld [vmem:[#allocation5 + $0x150] sm:$0xf] }
  0x32   : > { %v939_v12 = vor.u32 %v995_v9, %v936_v10  ;;  %v993_v15 = vld [vmem:[#allocation5 + $0x158] sm:$0xf0]  ;;  %522 = vmatpush.bf16.msra.mxu1 %v935_v7  ;;  %v827_v16 = vor.u32 %v969_v13, %v826_v11  ;;  %v968_v18 = vld [vmem:[#allocation5 + $0x94] sm:$0xf]  ;;  %v828_v19 = vld [vmem:[#allocation5 + $0x9c] sm:$0xf0] }
  0x33   : > { %535 = vmatpush.bf16.msra.mxu2 %v843_v8  ;;  %v923_v17 = vor.u32 %v993_v15, %v922_v14  ;;  %v992_v20 = vld [vmem:[#allocation5 + $0x154] sm:$0xf]  ;;  %v831_v21 = vor.u32 %v968_v18, %v828_v19  ;;  %v924_v22 = vld [vmem:[#allocation5 + $0x15c] sm:$0xf0]  ;;  %v814_v23 = vld [vmem:[#allocation5 + $0x78] sm:$0xf] }
  0x34   : > { %548 = vmatpush.bf16.msra.mxu3 %v939_v12  ;;  %v966_v24 = vld [vmem:[#allocation5 + $0x80] sm:$0xf0]  ;;  %v927_v25 = vor.u32 %v992_v20, %v924_v22  ;;  %v910_v26 = vld [vmem:[#allocation5 + $0x138] sm:$0xf]  ;;  %v965_v28 = vld [vmem:[#allocation5 + $0x7c] sm:$0xf] }
  0x35   : > { %v990_v27 = vld [vmem:[#allocation5 + $0x140] sm:$0xf0]  ;;  %510 = vmatpush.bf16.msra.mxu0 %v827_v16  ;;  %v815_v29 = vor.u32 %v966_v24, %v814_v23  ;;  %v816_v30 = vld [vmem:[#allocation5 + $0x84] sm:$0xf0]  ;;  %v989_v31 = vld [vmem:[#allocation5 + $0x13c] sm:$0xf] }
  0x36   : > { %v912_v32 = vld [vmem:[#allocation5 + $0x144] sm:$0xf0]  ;;  %523 = vmatpush.bf16.msra.mxu1 %v923_v17  ;;  %v911_v33 = vor.u32 %v990_v27, %v910_v26  ;;  %v819_v34 = vor.u32 %v965_v28, %v816_v30  ;;  %v802_v35 = vld [vmem:[#allocation5 + $0x60] sm:$0xf]  ;;  %v963_v36 = vld [vmem:[#allocation5 + $0x68] sm:$0xf0] }
  0x37   : > { %536 = vmatpush.bf16.msra.mxu2 %v831_v21  ;;  %v898_v37 = vld [vmem:[#allocation5 + $0x120] sm:$0xf]  ;;  %v915_v38 = vor.u32 %v989_v31, %v912_v32  ;;  %v987_v39 = vld [vmem:[#allocation5 + $0x128] sm:$0xf0]  ;;  %v962_v40 = vld [vmem:[#allocation5 + $0x64] sm:$0xf]  ;;  %v803_v44 = vor.u32 %v963_v36, %v802_v35 }
  0x38   : > { %549 = vmatpush.bf16.msra.mxu3 %v927_v25  ;;  %v804_v41 = vld [vmem:[#allocation5 + $0x6c] sm:$0xf0]  ;;  %v986_v42 = vld [vmem:[#allocation5 + $0x124] sm:$0xf]  ;;  %v899_v45 = vor.u32 %v987_v39, %v898_v37  ;;  %v790_v47 = vld [vmem:[#allocation5 + $0x48] sm:$0xf] }
  0x39   : > { %v900_v43 = vld [vmem:[#allocation5 + $0x12c] sm:$0xf0]  ;;  %511 = vmatpush.bf16.msra.mxu0 %v815_v29  ;;  %v807_v46 = vor.u32 %v962_v40, %v804_v41  ;;  %v960_v48 = vld [vmem:[#allocation5 + $0x50] sm:$0xf0]  ;;  %v886_v49 = vld [vmem:[#allocation5 + $0x108] sm:$0xf] }
  0x3a   : > { %524 = vmatpush.bf16.msra.mxu1 %v911_v33  ;;  %v903_v50 = vor.u32 %v986_v42, %v900_v43  ;;  %v984_v51 = vld [vmem:[#allocation5 + $0x110] sm:$0xf0]  ;;  %v959_v52 = vld [vmem:[#allocation5 + $0x4c] sm:$0xf]  ;;  %v792_v53 = vld [vmem:[#allocation5 + $0x54] sm:$0xf0]  ;;  %v791_v56 = vor.u32 %v960_v48, %v790_v47 }
  0x3b   : > { %537 = vmatpush.bf16.msra.mxu2 %v819_v34  ;;  %v983_v54 = vld [vmem:[#allocation5 + $0x10c] sm:$0xf]  ;;  %v888_v55 = vld [vmem:[#allocation5 + $0x114] sm:$0xf0]  ;;  %v887_v57 = vor.u32 %v984_v51, %v886_v49  ;;  %v795_v58 = vor.u32 %v959_v52, %v792_v53  ;;  %v778_v59 = vld [vmem:[#allocation5 + $0x30] sm:$0xf] }
  0x3c   : > { %550 = vmatpush.bf16.msra.mxu3 %v915_v38  ;;  %v957_v60 = vld [vmem:[#allocation5 + $0x38] sm:$0xf0]  ;;  %v874_v61 = vld [vmem:[#allocation5 + $0xf0] sm:$0xf]  ;;  %v891_v62 = vor.u32 %v983_v54, %v888_v55  ;;  %v956_v0 = vld [vmem:[#allocation5 + $0x34] sm:$0xf] }
  0x3d   : > { %512 = vmatpush.bf16.msra.mxu0 %v803_v44  ;;  %v981_v63 = vld [vmem:[#allocation5 + $0xf8] sm:$0xf0]  ;;  %v780_v1 = vld [vmem:[#allocation5 + $0x3c] sm:$0xf0]  ;;  %v980_v2 = vld [vmem:[#allocation5 + $0xf4] sm:$0xf]  ;;  %v779_v4 = vor.u32 %v957_v60, %v778_v59 }
  0x3e   : > { %525 = vmatpush.bf16.msra.mxu1 %v899_v45  ;;  %v876_v3 = vld [vmem:[#allocation5 + $0xfc] sm:$0xf0]  ;;  %v766_v5 = vld [vmem:[#allocation5 + $0x18] sm:$0xf]  ;;  %v875_v6 = vor.u32 %v981_v63, %v874_v61  ;;  %v783_v7 = vor.u32 %v956_v0, %v780_v1  ;;  %v954_v8 = vld [vmem:[#allocation5 + $0x20] sm:$0xf0] }
  0x3f   : > { %538 = vmatpush.bf16.msra.mxu2 %v807_v46  ;;  %v862_v9 = vld [vmem:[#allocation5 + $0xd8] sm:$0xf]  ;;  %v978_v10 = vld [vmem:[#allocation5 + $0xe0] sm:$0xf0]  ;;  %v879_v11 = vor.u32 %v980_v2, %v876_v3  ;;  %v953_v12 = vld [vmem:[#allocation5 + $0x1c] sm:$0xf]  ;;  %v767_v17 = vor.u32 %v954_v8, %v766_v5 }
  0x40   : > { %551 = vmatpush.bf16.msra.mxu3 %v903_v50  ;;  %v768_v13 = vld [vmem:[#allocation5 + $0x24] sm:$0xf0]  ;;  %v180_v14 = vld [vmem:[%s1306_s6] sm:$0xff]  ;;  %v863_v18 = vor.u32 %v978_v10, %v862_v9  ;;  %v754_v20 = vld [vmem:[#allocation5] sm:$0xf]  ;;  %vm610_vm1 = vcmask 27648  }
  0x41   : > { %513 = vmatpush.bf16.msra.mxu0 %v791_v56  ;;  %v977_v15 = vld [vmem:[#allocation5 + $0xdc] sm:$0xf]  ;;  %v864_v16 = vld [vmem:[#allocation5 + $0xe4] sm:$0xf0]  ;;  %182 = vst [vmem:[#allocation1] ss:$2 sm:$0xff] %v180_v14  ;;  %v771_v19 = vor.u32 %v953_v12, %v768_v13  ;;  %v604_v14 = vlaneseq }
  0x42   : > { %526 = vmatpush.bf16.msra.mxu1 %v887_v57  ;;  %v951_v21 = vld [vmem:[#allocation5 + $0x8] sm:$0xf0]  ;;  %v850_v22 = vld [vmem:[#allocation5 + $0xc0] sm:$0xf]  ;;  %v867_v23 = vor.u32 %v977_v15, %v864_v16  ;;  %v950_v25 = vld [vmem:[#allocation5 + $0x4] sm:$0xf] }
  0x43   : > { %539 = vmatpush.bf16.msra.mxu2 %v795_v58  ;;  %v975_v24 = vld [vmem:[#allocation5 + $0xc8] sm:$0xf0]  ;;  %v756_v26 = vld [vmem:[#allocation5 + $0xc] sm:$0xf0]  ;;  %v974_v27 = vld [vmem:[#allocation5 + $0xc4] sm:$0xf]  ;;  %v755_v29 = vor.u32 %v951_v21, %v754_v20 }
  0x44   : > { %552 = vmatpush.bf16.msra.mxu3 %v891_v62  ;;  %v852_v28 = vld [vmem:[#allocation5 + $0xcc] sm:$0xf0]  ;;  %v851_v30 = vor.u32 %v975_v24, %v850_v22  ;;  %v759_v31 = vor.u32 %v950_v25, %v756_v26  ;;  %v973_v50 = vld [vmem:[#allocation5 + $0xb8] sm:$0xf0]  ;;  %v834_v54 = vld [vmem:[#allocation5 + $0x98] sm:$0xf] }
  0x45   : > { %514 = vmatpush.bf16.msra.mxu0 %v779_v4  ;;  %v855_v32 = vor.u32 %v974_v27, %v852_v28  ;;  %v846_v49 = vld [vmem:[#allocation5 + $0xb0] sm:$0xf]  ;;  %v997_v53 = vld [vmem:[#allocation5 + $0x178] sm:$0xf0]  ;;  %v970_v55 = vld [vmem:[#allocation5 + $0xa0] sm:$0xf0] }
  0x46   : > { %527 = vmatpush.bf16.msra.mxu1 %v875_v6  ;;  %v942_v51 = vld [vmem:[#allocation5 + $0x170] sm:$0xf]  ;;  %v847_v52 = vor.u32 %v973_v50, %v846_v49  ;;  %v930_v57 = vld [vmem:[#allocation5 + $0x158] sm:$0xf]  ;;  %v994_v58 = vld [vmem:[#allocation5 + $0x160] sm:$0xf0]  ;;  %v835_v59 = vor.u32 %v970_v55, %v834_v54 }
  0x47   : > { %540 = vmatpush.bf16.msra.mxu2 %v783_v7  ;;  %v943_v56 = vor.u32 %v997_v53, %v942_v51  ;;  %v931_v60 = vor.u32 %v994_v58, %v930_v57  ;;  %v822_v61 = vld [vmem:[#allocation5 + $0x80] sm:$0xf]  ;;  %v967_v62 = vld [vmem:[#allocation5 + $0x88] sm:$0xf0]  ;;  %v810_v3 = vld [vmem:[#allocation5 + $0x68] sm:$0xf] }
  0x48   : > { %553 = vmatpush.bf16.msra.mxu3 %v879_v11  ;;  %v183_v33 = vld.sshfl [vmem:[#allocation1] sm:$0xff pattern:$0x75316420]  ;;  %v184_v34 = vld.sshfl [vmem:[#allocation1 + $0x8] sm:$0xff pattern:$0x75316420]  ;;  %v823_v1 = vor.u32 %v967_v62, %v822_v61 }
  0x49   : > { %515 = vmatpush.bf16.msra.mxu0 %v767_v17  ;;  %v1317_v35 = vpack.c.bf16 %v183_v33, %v183_v33  ;;  %v1319_v36 = vpack.c.bf16 %v184_v34, %v184_v34  ;;  %v918_v63 = vld [vmem:[#allocation5 + $0x140] sm:$0xf]  ;;  %v991_v0 = vld [vmem:[#allocation5 + $0x148] sm:$0xf0]  ;;  %v964_v4 = vld [vmem:[#allocation5 + $0x70] sm:$0xf0] }
  0x4a   : > { %528 = vmatpush.bf16.msra.mxu1 %v863_v18  ;;  %v919_v2 = vor.u32 %v991_v0, %v918_v63  ;;  %v906_v5 = vld [vmem:[#allocation5 + $0x128] sm:$0xf]  ;;  %v988_v6 = vld [vmem:[#allocation5 + $0x130] sm:$0xf0]  ;;  %v811_v7 = vor.u32 %v964_v4, %v810_v3  ;;  %v798_v9 = vld [vmem:[#allocation5 + $0x50] sm:$0xf] }
  0x4b   : > { %541 = vmatpush.bf16.msra.mxu2 %v771_v19  ;;  %v907_v8 = vor.u32 %v988_v6, %v906_v5  ;;  %v961_v10 = vld [vmem:[#allocation5 + $0x58] sm:$0xf0]  ;;  %v894_v11 = vld [vmem:[#allocation5 + $0x110] sm:$0xf]  ;;  %v786_v16 = vld [vmem:[#allocation5 + $0x38] sm:$0xf] }
  0x4c   : > { %554 = vmatpush.bf16.msra.mxu3 %v867_v23  ;;  %v985_v12 = vld [vmem:[#allocation5 + $0x118] sm:$0xf0]  ;;  %v799_v13 = vor.u32 %v961_v10, %v798_v9  ;;  %v958_v17 = vld [vmem:[#allocation5 + $0x40] sm:$0xf0]  ;;  %v882_v18 = vld [vmem:[#allocation5 + $0xf8] sm:$0xf] }
  0x4d   : > { %516 = vmatpush.bf16.msra.mxu0 %v755_v29  ;;  %v895_v15 = vor.u32 %v985_v12, %v894_v11  ;;  %v982_v19 = vld [vmem:[#allocation5 + $0x100] sm:$0xf0]  ;;  %v787_v20 = vor.u32 %v958_v17, %v786_v16  ;;  %v605_v21 = vshrl.u32 %v604_v14, 7  ;;  %v607_v22 = vand.u32 127, %v604_v14  ;;  %v774_v24 = vld [vmem:[#allocation5 + $0x20] sm:$0xf] }
  0x4e   : > { %529 = vmatpush.bf16.msra.mxu1 %v851_v30  ;;  %v883_v23 = vor.u32 %v982_v19, %v882_v18  ;;  %v955_v25 = vld [vmem:[#allocation5 + $0x28] sm:$0xf0]  ;;  %v870_v26 = vld [vmem:[#allocation5 + $0xe0] sm:$0xf]  ;;  %v858_v34 = vld [vmem:[#allocation5 + $0xc8] sm:$0xf] }
  0x4f   : > { %542 = vmatpush.bf16.msra.mxu2 %v759_v31  ;;  %v979_v27 = vld [vmem:[#allocation5 + $0xe8] sm:$0xf0]  ;;  %v775_v28 = vor.u32 %v955_v25, %v774_v24  ;;  %vm608_vm0 = vcmp.le.s32.totalorder %v607_v22, %v605_v21  ;;  %v762_v31 = vld [vmem:[#allocation5 + $0x8] sm:$0xf]  ;;  %vm627_vm2 = vcmask 1041408   ;;  %vm623_vm3 = vcmask 31744  }
  0x50   : > { %555 = vmatpush.bf16.msra.mxu3 %v855_v32  ;;  %517 = vmatmul.bf16.vlgmr.msra.gmra.mxu0 %v1317_v35  ;;  %v871_v30 = vor.u32 %v979_v27, %v870_v26  ;;  %v952_v32 = vld [vmem:[#allocation5 + $0x10] sm:$0xf0]  ;;  %s946_s17 = sshll.u32 %s1235_s16, 2  ;;  %s751_s27 = sshll.u32 %s1302_s29, 2 }
  0x51   : > { %530 = vmatmul.bf16.vlgmr.msra.gmra.mxu1 %v1319_v36  ;;  %561 = vmatpush.bf16.msrb.mxu0 %v847_v52  ;;  %s656_s13 = scalar_lea.hbm %s1365_s2, %s946_s17  ;;  %s178_s14 = scalar_lea.vmem [#allocation7], %s751_s27 }
  0x52   : > { %543 = vmatmul.bf16.vlgmr.msra.gmra.mxu2 %v1317_v35  ;;  %574 = vmatpush.bf16.msrb.mxu1 %v943_v56  ;;  %s658_s15 = sshll.u32 %s178_s14, 4  ;;  %s660_s18 = sshll.u32 %s656_s13, 4  ;;  %s659_s15 = int_to_ptr.vmem [resolvable:$true] %s658_s15  ;;  %s661_s18 = int_to_ptr.hbm [resolvable:$true] %s660_s18 }
  0x53   : > { %556 = vmatmul.bf16.vlgmr.msra.gmra.mxu3 %v1319_v36  ;;  %s646_s19 = scalar_lea.sflag [#allocation4], %s1302_s29  ;;  %s1135_s20 = sshra.s32 %s661_s18, 4  ;;  %s1136_s20 = int_to_ptr.hbm [resolvable:$true] %s1135_s20 }
  0x54   : > { %s1137_s21 = scalar_lea.hbm %s1136_s20, 4  ;;  %s1141_s24 = scalar_lea.hbm %s1365_s2, 8 }
  0x55   : > { %562 = vmatpush.bf16.msrb.mxu0 %v835_v59  ;;  %p1138_p1 = scmp.ne.s32.totalorder %s1136_s20, %s1137_s21  ;;  %p1142_p12 = scmp.lt.s32.totalorder %s1136_s20, %s1365_s2 }
  0x56   : > { %575 = vmatpush.bf16.msrb.mxu1 %v931_v60  ;;  %p1143_p8 = scmp.lt.s32.totalorder %s1141_s24, %s1137_s21 }
  0x57   : > { %p1139_p3 = pnand %p1138_p1, %p1271_p13 }
  0x58   : > { %p1144_p7 = por %p1143_p8, %p1142_p12 }
  0x59   : > { %563 = vmatpush.bf16.msrb.mxu0 %v823_v1  ;;  %p1140_p5 = pneg %p1139_p3 }
  0x5a   : > { %576 = vmatpush.bf16.msrb.mxu1 %v919_v2 }
  0x5b   : > { %p1145_p9 = pnand %p1144_p7, %p1140_p5 }
  0x5d   : > { %564 = vmatpush.bf16.msrb.mxu0 %v811_v7 }
  0x5e   : > { %577 = vmatpush.bf16.msrb.mxu1 %v907_v8 }
  0x61   : > { %565 = vmatpush.bf16.msrb.mxu0 %v799_v13 }
  0x62   : > { %578 = vmatpush.bf16.msrb.mxu1 %v895_v15 }
  0x65   : > { %566 = vmatpush.bf16.msrb.mxu0 %v787_v20 }
  0x66   : > { %579 = vmatpush.bf16.msrb.mxu1 %v883_v23 }
  0x69   : > { %567 = vmatpush.bf16.msrb.mxu0 %v775_v28 }
  0x6a   : > { %580 = vmatpush.bf16.msrb.mxu1 %v871_v30 }
  0xcd   : > { %v518_v37 = vpop.f32.mrf.mxu0 }
  0xce   : > { %v531_v38 = vpop.f32.mrf.mxu1 }
  0xcf   : > { %v532_v39 = vadd.f32 %v531_v38, %v518_v37  ;;  %v976_v37 = vld [vmem:[#allocation5 + $0xd0] sm:$0xf0] }
  0xd1   : > { %v587_v40 = vpack.c.bf16 %v532_v39, %v532_v39  ;;  %v763_v39 = vor.u32 %v952_v32, %v762_v31 }
  0xd3   : > { %597 = vmatpush.bf16.xpose.msrb.mxu2 %v587_v40  ;;  %568 = vmatpush.bf16.msrb.mxu0 %v763_v39 }
  0xd5   : > { %v544_v41 = vpop.f32.mrf.mxu2  ;;  %v520_v43 = vpop.f32.mrf.mxu0 }
  0xd6   : > { %v557_v42 = vpop.f32.mrf.mxu3  ;;  %v533_v45 = vpop.f32.mrf.mxu1  ;;  %569 = vmatmul.bf16.vlgmr.msrb.gmra.mxu0 %v1317_v35 }
  0xd7   : > { %v558_v44 = vadd.f32 %v557_v42, %v544_v41  ;;  %v859_v41 = vor.u32 %v976_v37, %v858_v34 }
  0xd9   : > { %v588_v46 = vpack.c.bf16 %v558_v44, %v558_v44  ;;  %581 = vmatpush.bf16.msrb.mxu1 %v859_v41 }
  0xdb   : > { %598 = vmatmul.bf16.vlgmr.msrb.gmra.mxu2 %v588_v46 }
  0xdc   : > { %582 = vmatmul.bf16.vlgmr.msrb.gmra.mxu1 %v1319_v36 }
  0xdd   : > { %v546_v47 = vpop.f32.mrf.mxu2 }
  0xde   : > { %v559_v48 = vpop.f32.mrf.mxu3 }
 0x153   : > { %v570_v48 = vpop.f32.mrf.mxu0 }
 0x159   : > { %v583_v49 = vpop.f32.mrf.mxu1 }
 0x15a   : > { %v584_v50 = vadd.f32 %v583_v49, %v570_v48 }
 0x15b   : > { %v572_v51 = vpop.f32.mrf.mxu0 }
 0x15c   : > { %v589_v53 = vpack.c.bf16 %v584_v50, %v584_v50 }
 0x15e   : > { %v599_v29 = vpop.f32.mrf.mxu2  ;;  %v629_v35 = vsel %vm627_vm2, %v589_v53, 0 }
 0x15f   : > { %v603_v33 = vmul.f32 0.0625, %v599_v29  ;;  %638 = vmatpush.bf16.msrb.mxu3 %v629_v35 }
 0x161   : > { %v609_v38 = vsel %vm608_vm0, %v603_v33, -1e+30  ;;  %v585_v52 = vpop.f32.mrf.mxu1 }
 0x162   : > { %v611_v40 = vsel %vm610_vm1, %v609_v38, -inf }
 0x163   : > { %612 = vmax.xlane.f32.xlu0 %v611_v40 }
 0x166   : > { %v601_v42 = vpop.f32.mrf.mxu2 }
 0x1d6   : > { %v613_v43 = vpop.xlane.xlu0 %612 }
 0x1d7   : > { %v614_v44 = vsub.f32 %v609_v38, %v613_v43 }
 0x1d9   : > { %v615_v45 = vmul.f32 1.442695, %v614_v44 }
 0x1db   : > { %1057 = vpow2.f32 %v615_v45 }
 0x1e1   : > { %v1058_v46 = vpop.eup %1057 }
 0x1e2   : > { %v617_v47 = vsel %vm610_vm1, %v1058_v46, 0.0 }
 0x1e3   : > { %618 = vadd.xlane.f32.xlu0 %v617_v47 }
 0x256   : > { %v619_v36 = vpop.xlane.xlu0 %618 }
 0x257   : > { %1059 = vrcp.f32 %v619_v36 }
 0x25d   : > { %v1060_v54 = vpop.eup %1059 }
 0x25e   : > { %v621_v55 = vmul.f32 %v1060_v54, %v1058_v46 }
 0x260   : > { %v622_v56 = vpack.c.bf16 %v621_v55, %v621_v55 }
 0x262   : > { %944 = vmatmul.msk.bf16.vlgmr.msrb.gmra.mxu3 %vm623_vm3, %v622_v56 }
 0x2e5   : > { %v640_v57 = vpop.f32.mrf.mxu3 }
 0x2e6   : > { %644 = vst [vmem:[%s178_s14] sm:$0xf] %v640_v57 }
 0x2e7   : > { %1148 = shalt.err (!%p1145_p9)
}
 0x2e8   : > { %1004 = dma.vmem_to_hbm [thread:$0]  (%p1271_p13), %s659_s15, 64, %s661_s18, %s646_s19  }
 0x2ed   : > { %v642_v58 = vpop.f32.mrf.mxu3 }
 0x2ee PF: > { %s672_s29 = sand.u32 1, %s1179_s9   ;;  %p1371_p10 = scmp.ge.s32.totalorder %s1191_s12, 2 }
 0x2ef   : > { %s673_s4 = scalar_lea.sflag [#allocation4], %s672_s29 }
 0x2f0   : > { %p1015_p11 = pnand %p1371_p10, %p1276_p4 }
 0x2f2   : > { %p1016_p0 = pneg %p1015_p11 }
 0x2f4   : > { %1174 = dma.done.wait (%p1016_p0), %s673_s4, 64  }
 0x2f5   : > { %1176 = vsyncadd (%p1016_p0), %s673_s4, 4294967232  ;;  %p16_p2 = scmp.ge.s32.totalorder %s1251_s23, 4   ;;  %s1372_s9 = smov %s1183_s10 }
 0x2f6   : > { %s1373_s10 = smov %s1187_s11  ;;  %s1374_s11 = smov %s1263_s26 }
 0x2f7   : > { %s1375_s12 = smov %s1251_s23  ;;  %18 = sbr.rel (!%p16_p2) target bundleno = 6 (0x6), region = 77 }
 0x2fc   :  { %679 = vsyncpa [#allocation3], 1 }
 0x2fd   :  { %681 = vsyncpa [#allocation3 + $0x1], 1 }
 0x2fe   :  { %682 = vsyncpa [#allocation6], 1 }
 0x2ff   :  { %683 = vsyncpa [#allocation4], 1 }
 0x300   :  { %685 = vsyncpa [#allocation4 + $0x1], 1 }

</bundles_post_ra>
